<compile_context>
chip_gen: v5e
topology: v5e:2x2
jax: 0.10.0
libtpu: 0.0.40
codegen_flags: <defaults>
</compile_context>

<pallas_src>
import functools
import math

import jax
import jax.numpy as jnp
from jax.experimental import pallas as pl
from jax.experimental.pallas import tpu as pltpu


_MAX_PACKED_WIDTH = 384   # cap on g*C for the packed path (seg-matmul flops ~ P)
_F32_TEMPS_ROWS = 8       # conservative live f32 tile copies (packed/rows kernels)
_F32_TEMPS_CF = 6         # channels_first kernel


def _round_up(v, m):
    return ((v + m - 1) // m) * m


@functools.lru_cache(maxsize=1)
def _vmem_budget():
    """Returns (scoped vmem_limit_bytes, tile byte budget) for this chip."""
    cap = 64 * 1024 * 1024                      # conservative default (v7x per-TC)
    try:
        info = pltpu.get_tpu_info()
        cap = int(getattr(info, "vmem_capacity_bytes", cap)) or cap
    except Exception:
        pass
    # ~62% of physical VMEM as the scoped limit (128 MiB -> 80, 64 -> 40),
    # then ~60% of that for the pipelined I/O tiles + f32 temporaries.
    limit = max(32 * 1024 * 1024, min(cap * 5 // 8, 96 * 1024 * 1024))
    return limit, limit * 3 // 5


def _pick_tile_rows(rows, width, itemsize, budget):
    """Row-tile size for the (rows, width) channels-last kernels."""
    if rows <= 8:
        return rows
    # Per tile row: double-buffered in+out tiles in the input dtype plus
    # ~_F32_TEMPS_ROWS live f32 copies from the in-kernel upcast.
    bytes_per_row = width * (4 * itemsize + 4 * _F32_TEMPS_ROWS)
    tm = max(8, min(budget // bytes_per_row, 16384))
    if tm >= rows:
        if rows >= 64:
            # Whole array fits in one step: split in two so both v7x
            # TensorCores get work (one extra ~0.35us step elsewhere).
            tm = _round_up(pl.cdiv(rows, 2), 8)
        else:
            tm = _round_up(rows, 8)
    else:
        tm = (tm // 8) * 8
    return max(tm, 8)


def _pick_tile_lanes(hw, c, itemsize, budget):
    """Spatial (lane) tile size for the channels-first kernel."""
    c_pad = _round_up(c, 8)   # sublane padding of the (C, T) tile
    bytes_per_lane = c_pad * (4 * itemsize + 4 * _F32_TEMPS_CF)
    t = max(128, min(budget // bytes_per_lane, 65536))
    t = (t // 128) * 128
    if t >= hw:
        return hw             # full spatial extent (equal-to-dim is allowed)
    return t


# --------------------------------------------------------------------------
# Kernels
# --------------------------------------------------------------------------
def _segment_sums(v, seg):
    # Per-segment sums of v, broadcast back to every lane of the segment, via
    # two single-pass bf16 MXU matmuls against the 0/1 block-diagonal `seg`.
    # v is split into a bf16-exact "hi" part plus a small residual so the
    # result is f32-accurate (a single bf16 pass alone costs ~2^-9 relative).
    hi = v.astype(jnp.bfloat16)
    lo = (v - hi.astype(jnp.float32)).astype(jnp.bfloat16)
    return (jnp.dot(hi, seg, preferred_element_type=jnp.float32)
            + jnp.dot(lo, seg, preferred_element_type=jnp.float32))


def _layernorm_packed_kernel(x_ref, seg_ref, w_ref, b_ref, o_ref, *, eps, c):
    """channels_last, g = P // c logical rows packed per lane block."""
    x = x_ref[...].astype(jnp.float32)                  # (tm, P)
    seg = seg_ref[...]                                  # (P, P) bf16, block-diag 0/1
    inv_c = 1.0 / c
    sx = _segment_sums(x, seg)
    sxx = _segment_sums(x * x, seg)
    mean = sx * inv_c
    var = jnp.maximum(sxx * inv_c - mean * mean, 0.0)
    inv = jax.lax.rsqrt(var + eps)
    w = w_ref[...].astype(jnp.float32)                  # (1, P)
    b = b_ref[...].astype(jnp.float32)
    o_ref[...] = ((x - mean) * inv * w + b).astype(o_ref.dtype)


def _layernorm_rows_kernel(x_ref, w_ref, b_ref, o_ref, *, eps, c):
    """channels_last, generic C: reduce over the lane (last) axis."""
    x = x_ref[...].astype(jnp.float32)                  # (tm, C)
    inv_c = 1.0 / c
    sx = jnp.sum(x, axis=-1, keepdims=True)
    sxx = jnp.sum(x * x, axis=-1, keepdims=True)
    mean = sx * inv_c
    var = jnp.maximum(sxx * inv_c - mean * mean, 0.0)
    inv = jax.lax.rsqrt(var + eps)
    o_ref[...] = ((x - mean) * inv * w_ref[...].astype(jnp.float32)
                  + b_ref[...].astype(jnp.float32)).astype(o_ref.dtype)


def _layernorm_cf_kernel(x_ref, w_ref, b_ref, o_ref, *, eps, c):
    """channels_first: block is (1, C, T); reduce over the sublane (C) axis."""
    x = x_ref[...].astype(jnp.float32)                  # (1, C, T)
    inv_c = 1.0 / c
    sx = jnp.sum(x, axis=1, keepdims=True)              # (1, 1, T)
    sxx = jnp.sum(x * x, axis=1, keepdims=True)
    mean = sx * inv_c
    var = jnp.maximum(sxx * inv_c - mean * mean, 0.0)
    inv = jax.lax.rsqrt(var + eps)
    w = w_ref[...].astype(jnp.float32)[None]            # (1, C, 1)
    b = b_ref[...].astype(jnp.float32)[None]
    o_ref[...] = ((x - mean) * inv * w + b).astype(o_ref.dtype)


# --------------------------------------------------------------------------
# Wrappers
# --------------------------------------------------------------------------
def _layernorm_channels_last_2d(x2d, weight, bias, eps):
    """x2d: (N, C) -> LayerNorm over C per row."""
    n, c = x2d.shape
    itemsize = jnp.dtype(x2d.dtype).itemsize
    vmem_limit, tile_budget = _vmem_budget()

    g = 128 // math.gcd(c, 128)
    p = g * c
    use_packed = (g > 1) and (p <= _MAX_PACKED_WIDTH) and (n % g == 0)

    if use_packed:
        rows = n // g
        xk = x2d.reshape(rows, p)                  # same element order: free
        wk = jnp.tile(weight, g).reshape(1, p)
        bk = jnp.tile(bias, g).reshape(1, p)
        lane = jnp.arange(p, dtype=jnp.int32) // c
        seg = (lane[:, None] == lane[None, :]).astype(jnp.bfloat16)
        kernel = functools.partial(_layernorm_packed_kernel, eps=eps, c=c)
        extra_inputs = (seg,)
        extra_specs = [pl.BlockSpec((p, p), lambda i: (0, 0))]
    else:
        # NOTE: silently falls back when n % g != 0 or g*C is too wide; rows
        # kernel is correct but not lane-dense for C not a multiple of 128.
        p = c
        rows = n
        xk = x2d
        wk = weight.reshape(1, c)
        bk = bias.reshape(1, c)
        kernel = functools.partial(_layernorm_rows_kernel, eps=eps, c=c)
        extra_inputs = ()
        extra_specs = []

    tm = _pick_tile_rows(rows, p, itemsize, tile_budget)
    grid = (pl.cdiv(rows, tm),)

    in_specs = ([pl.BlockSpec((tm, p), lambda i: (i, 0))]
                + extra_specs
                + [pl.BlockSpec((1, p), lambda i: (0, 0)),
                   pl.BlockSpec((1, p), lambda i: (0, 0))])

    out = pl.pallas_call(
        kernel,
        out_shape=jax.ShapeDtypeStruct((rows, p), x2d.dtype),
        grid_spec=pltpu.PrefetchScalarGridSpec(
            num_scalar_prefetch=0,
            grid=grid,
            in_specs=in_specs,
            out_specs=pl.BlockSpec((tm, p), lambda i: (i, 0)),
        ),
        compiler_params=pltpu.CompilerParams(
            dimension_semantics=("parallel",),
            vmem_limit_bytes=vmem_limit,
        ),
    )(xk, *extra_inputs, wk, bk)
    return out.reshape(n, c)


def _layernorm_channels_first(x, weight, bias, eps):
    """x: (B, C, H, W) -> LayerNorm over C, no wrapper transposes."""
    b, c, h, w = x.shape
    hw = h * w
    x3 = x.reshape(b, c, hw)                       # contiguous reshape: free
    itemsize = jnp.dtype(x.dtype).itemsize
    vmem_limit, tile_budget = _vmem_budget()
    t_hw = _pick_tile_lanes(hw, c, itemsize, tile_budget)
    grid = (b, pl.cdiv(hw, t_hw))
    w2 = weight.reshape(c, 1)
    b2 = bias.reshape(c, 1)

    out = pl.pallas_call(
        functools.partial(_layernorm_cf_kernel, eps=eps, c=c),
        out_shape=jax.ShapeDtypeStruct((b, c, hw), x.dtype),
        grid_spec=pltpu.PrefetchScalarGridSpec(
            num_scalar_prefetch=0,
            grid=grid,
            in_specs=[
                pl.BlockSpec((1, c, t_hw), lambda bi, si: (bi, 0, si)),
                pl.BlockSpec((c, 1), lambda bi, si: (0, 0)),
                pl.BlockSpec((c, 1), lambda bi, si: (0, 0)),
            ],
            out_specs=pl.BlockSpec((1, c, t_hw), lambda bi, si: (bi, 0, si)),
        ),
        compiler_params=pltpu.CompilerParams(
            dimension_semantics=("parallel", "parallel"),
            vmem_limit_bytes=vmem_limit,
        ),
    )(x3, w2, b2)
    return out.reshape(b, c, h, w)


def layer_norm(x, weight, bias, eps=1e-6, data_format="channels_last"):
    """ConvNeXt LayerNorm.

    channels_last:  x is (..., C), normalized over the last dim.
    channels_first: x is (B, C, H, W), normalized over dim 1.
    """
    if data_format not in ("channels_last", "channels_first"):
        raise NotImplementedError(data_format)

    if data_format == "channels_last":
        c = x.shape[-1]
        lead = x.shape[:-1]
        out = _layernorm_channels_last_2d(x.reshape(-1, c), weight, bias, eps)
        return out.reshape(*lead, c)
    else:
        return _layernorm_channels_first(x, weight, bias, eps)


# --------------------------------------------------------------------------
# Reference + tests
# --------------------------------------------------------------------------
def _reference_layer_norm(x, weight, bias, eps, data_format):
    x32 = x.astype(jnp.float32)
    if data_format == "channels_last":
        u = x32.mean(-1, keepdims=True)
        s = ((x32 - u) ** 2).mean(-1, keepdims=True)
        y = (x32 - u) / jnp.sqrt(s + eps)
        return y * weight + bias
    else:
        u = x32.mean(1, keepdims=True)
        s = ((x32 - u) ** 2).mean(1, keepdims=True)
        y = (x32 - u) / jnp.sqrt(s + eps)
        return weight[:, None, None] * y + bias[:, None, None]


if __name__ == "__main__":
    key = jax.random.PRNGKey(0)
    ks = jax.random.split(key, 12)
    eps = 1e-6

    # --- channels_first: x (B, C, H, W) = (2, 4, 16, 16), normalized over C=4
    x_cf = jax.random.normal(ks[0], (2, 4, 16, 16), dtype=jnp.float32)
    w_cf = 1.0 + 0.1 * jax.random.normal(ks[1], (4,), dtype=jnp.float32)
    b_cf = 0.1 * jax.random.normal(ks[2], (4,), dtype=jnp.float32)
    out_cf = jax.block_until_ready(
        layer_norm(x_cf, w_cf, b_cf, eps=eps, data_format="channels_first"))
    ref_cf = _reference_layer_norm(x_cf, w_cf, b_cf, eps, "channels_first")
    assert out_cf.shape == x_cf.shape
    assert jnp.max(jnp.abs(out_cf - ref_cf)) < 1e-4

    # --- channels_last, packed path with P = 128: (2, 8, 8, 32), C = 32
    x1 = jax.random.normal(ks[3], (2, 8, 8, 32), dtype=jnp.float32)
    w1 = 1.0 + 0.1 * jax.random.normal(ks[4], (32,), dtype=jnp.float32)
    b1 = 0.1 * jax.random.normal(ks[5], (32,), dtype=jnp.float32)
    out1 = jax.block_until_ready(layer_norm(x1, w1, b1, eps=eps))
    ref1 = _reference_layer_norm(x1, w1, b1, eps, "channels_last")
    assert out1.shape == x1.shape
    assert jnp.max(jnp.abs(out1 - ref1)) < 1e-4

    # --- channels_last, packed path with P = 384 (ConvNeXt C = 96): (2, 4, 4, 96)
    x2 = jax.random.normal(ks[6], (2, 4, 4, 96), dtype=jnp.float32)
    w2 = jnp.linspace(0.8, 1.2, 96, dtype=jnp.float32)
    b2 = jnp.linspace(-0.1, 0.1, 96, dtype=jnp.float32)
    out2 = jax.block_until_ready(layer_norm(x2, w2, b2, eps=eps))
    ref2 = _reference_layer_norm(x2, w2, b2, eps, "channels_last")
    assert out2.shape == x2.shape
    assert jnp.max(jnp.abs(out2 - ref2)) < 1e-4

    # --- channels_last, generic fallback (C = 160: g*C = 640 > pack cap)
    x3 = jax.random.normal(ks[7], (2, 4, 4, 160), dtype=jnp.float32)
    w3 = 1.0 + 0.1 * jax.random.normal(ks[8], (160,), dtype=jnp.float32)
    b3 = 0.1 * jax.random.normal(ks[9], (160,), dtype=jnp.float32)
    out3 = jax.block_until_ready(layer_norm(x3, w3, b3, eps=eps))
    ref3 = _reference_layer_norm(x3, w3, b3, eps, "channels_last")
    assert out3.shape == x3.shape
    assert jnp.max(jnp.abs(out3 - ref3)) < 1e-4

    print("KERNEL_OK")
</pallas_src>

<mosaic_0001>
module attributes {stable_mosaic.version = 11 : i64} {
  func.func @_layernorm_cf_kernel(%arg0: i32, %arg1: i32, %arg2: memref<1x4x256xf32, #tpu.memory_space<vmem>>, %arg3: memref<4x1xf32, #tpu.memory_space<vmem>>, %arg4: memref<4x1xf32, #tpu.memory_space<vmem>>, %arg5: memref<1x4x256xf32, #tpu.memory_space<vmem>>) attributes {dimension_semantics = [#tpu.dimension_semantics<parallel>, #tpu.dimension_semantics<parallel>], iteration_bounds = array<i64: 2, 1>, scalar_prefetch = 0 : i64, scratch_operands = 0 : i64, tpu.core_type = #tpu.core_type<tc>, window_params = [{transform_indices = @transform_0, window_bounds = array<i64: 1, 4, 256>}, {pipeline_mode = #tpu.pipeline_mode<synchronous>, transform_indices = @transform_1, window_bounds = array<i64: 4, 1>}, {pipeline_mode = #tpu.pipeline_mode<synchronous>, transform_indices = @transform_2, window_bounds = array<i64: 4, 1>}, {transform_indices = @transform_3, window_bounds = array<i64: 1, 4, 256>}]} {
    %c0 = arith.constant 0 : index
    %c0_0 = arith.constant 0 : index
    %c0_1 = arith.constant 0 : index
    %0 = vector.load %arg2[%c0, %c0_0, %c0_1] : memref<1x4x256xf32, #tpu.memory_space<vmem>>, vector<1x4x256xf32>
    %cst = arith.constant dense<0.000000e+00> : vector<1x256xf32>
    %1 = vector.multi_reduction <add>, %0, %cst [1] : vector<1x4x256xf32> to vector<1x256xf32>
    %2 = vector.shape_cast %1 : vector<1x256xf32> to vector<1x1x256xf32>
    %3 = arith.mulf %0, %0 : vector<1x4x256xf32>
    %cst_2 = arith.constant dense<0.000000e+00> : vector<1x256xf32>
    %4 = vector.multi_reduction <add>, %3, %cst_2 [1] : vector<1x4x256xf32> to vector<1x256xf32>
    %5 = vector.shape_cast %4 : vector<1x256xf32> to vector<1x1x256xf32>
    %cst_3 = arith.constant 2.500000e-01 : f32
    %6 = vector.broadcast %cst_3 : f32 to vector<1x1x256xf32>
    %7 = arith.mulf %2, %6 : vector<1x1x256xf32>
    %cst_4 = arith.constant 2.500000e-01 : f32
    %8 = vector.broadcast %cst_4 : f32 to vector<1x1x256xf32>
    %9 = arith.mulf %5, %8 : vector<1x1x256xf32>
    %10 = arith.mulf %7, %7 : vector<1x1x256xf32>
    %11 = arith.subf %9, %10 : vector<1x1x256xf32>
    %cst_5 = arith.constant 0.000000e+00 : f32
    %12 = vector.broadcast %cst_5 : f32 to vector<1x1x256xf32>
    %13 = arith.maximumf %11, %12 : vector<1x1x256xf32>
    %cst_6 = arith.constant 9.99999997E-7 : f32
    %14 = vector.broadcast %cst_6 : f32 to vector<1x1x256xf32>
    %15 = arith.addf %13, %14 : vector<1x1x256xf32>
    %16 = math.rsqrt %15 : vector<1x1x256xf32>
    %c0_7 = arith.constant 0 : index
    %c0_8 = arith.constant 0 : index
    %17 = vector.load %arg3[%c0_7, %c0_8] : memref<4x1xf32, #tpu.memory_space<vmem>>, vector<4x1xf32>
    %18 = vector.shape_cast %17 : vector<4x1xf32> to vector<1x4x1xf32>
    %c0_9 = arith.constant 0 : index
    %c0_10 = arith.constant 0 : index
    %19 = vector.load %arg4[%c0_9, %c0_10] : memref<4x1xf32, #tpu.memory_space<vmem>>, vector<4x1xf32>
    %20 = vector.shape_cast %19 : vector<4x1xf32> to vector<1x4x1xf32>
    %21 = vector.broadcast %7 : vector<1x1x256xf32> to vector<1x4x256xf32>
    %22 = arith.subf %0, %21 : vector<1x4x256xf32>
    %23 = vector.broadcast %16 : vector<1x1x256xf32> to vector<1x4x256xf32>
    %24 = arith.mulf %22, %23 : vector<1x4x256xf32>
    %25 = vector.broadcast %18 : vector<1x4x1xf32> to vector<1x4x256xf32>
    %26 = arith.mulf %24, %25 : vector<1x4x256xf32>
    %27 = vector.broadcast %20 : vector<1x4x1xf32> to vector<1x4x256xf32>
    %28 = arith.addf %26, %27 : vector<1x4x256xf32>
    %c0_11 = arith.constant 0 : index
    %c0_12 = arith.constant 0 : index
    %c0_13 = arith.constant 0 : index
    %29 = vector.load %arg5[%c0_11, %c0_12, %c0_13] : memref<1x4x256xf32, #tpu.memory_space<vmem>>, vector<1x4x256xf32>
    tpu.vector_store %arg5[%c0_11, %c0_12, %c0_13], %28 {strides = array<i32>} : memref<1x4x256xf32, #tpu.memory_space<vmem>>, vector<1x4x256xf32>,
    return
  }
  func.func @transform_0(%arg0: i32, %arg1: i32) -> (i32, i32, i32) {
    %c0_i32 = arith.constant 0 : i32
    %c0_i32_0 = arith.constant 0 : i32
    return %arg0, %c0_i32, %arg1 : i32, i32, i32
  }
  func.func @transform_1(%arg0: i32, %arg1: i32) -> (i32, i32) {
    %c0_i32 = arith.constant 0 : i32
    %c0_i32_0 = arith.constant 0 : i32
    %c0_i32_1 = arith.constant 0 : i32
    return %c0_i32, %c0_i32_0 : i32, i32
  }
  func.func @transform_2(%arg0: i32, %arg1: i32) -> (i32, i32) {
    %c0_i32 = arith.constant 0 : i32
    %c0_i32_0 = arith.constant 0 : i32
    %c0_i32_1 = arith.constant 0 : i32
    return %c0_i32, %c0_i32_0 : i32, i32
  }
  func.func @transform_3(%arg0: i32, %arg1: i32) -> (i32, i32, i32) {
    %c0_i32 = arith.constant 0 : i32
    %c0_i32_0 = arith.constant 0 : i32
    return %arg0, %c0_i32, %arg1 : i32, i32, i32
  }
}

</mosaic_0001>

<bundles_post_ra>
// kernel: tpu_custom_call.1
= control target key start
LH: loop header
LB: loop body
LE: loop exit
PB: predicated region body
PF: predicated region fallthrough
CT: control target
= control target key end

     0   :  { %8 = vsyncpa [#allocation3], 0  ;;  %s786_s0 = inlined_call_operand.hbm [shape: f32[2,4,256], index: 0, kind: input, shape index: {}]   ;;  %s787_s1 = inlined_call_operand.vmem [shape: f32[4,1], index: 1, kind: input, shape index: {}]   ;;  %s788_s2 = inlined_call_operand.vmem [shape: f32[4,1], index: 2, kind: input, shape index: {}]   ;;  %s789_s3 = inlined_call_operand.hbm [shape: f32[2,4,256], index: 3, kind: output, shape index: {}]  }
   0x1   :  { %10 = vsyncpa [#allocation3 + $0x1], 0 }
   0x2   :  { %11 = vsyncpa [#allocation4], 0 }
   0x3   :  { %13 = vsyncpa [#allocation4 + $0x1], 0  ;;  %s644_s12 = smov 0   ;;  %s646_s13 = smov 0  }
   0x4   :  { %s648_s14 = smov 0   ;;  %s650_s15 = smov 0  }
   0x5   :  { %s652_s16 = smov 0   ;;  %s654_s17 = smov 0  }
   0x6 LB: > { %s422_s18 = sadd.s32 4294967295, %s620_s17   ;;  %s423_s19 = sadd.s32 4294967294, %s620_s17   ;;  %s620_s17 = sphi %s654_s17, %s19_s17   ;;  %s616_s16 = sphi %s652_s16, %s798_s16   ;;  %s612_s15 = sphi %s650_s15, %s797_s15   ;;  %s608_s14 = sphi %s648_s14, %s796_s14   ;;  %s604_s13 = sphi %s646_s13, %s795_s13   ;;  %s600_s12 = sphi %s644_s12, %s794_s12  }
   0x7   : > { %s31_s20 = sadd.s32 1, %s616_s16  ;;  %s40_s21 = sadd.s32 1, %s608_s14 }
   0x8   : > { %p33_p0 = scmp.ge.s32.totalorder %s31_s20, 2  ;;  %p47_p1 = scmp.ne.s32.totalorder %s608_s14, %s604_s13 }
   0x9   : > { %p48_p2 = scmp.eq.s32.totalorder %s620_s17, 0  ;;  %p53_p3 = scmp.ne.s32.totalorder %s604_s13, %s600_s12 }
   0xa   : > { %s800_s20 = smov (%p33_p0, %s31_s20), 0  ;;  %p54_p5 = scmp.eq.s32.totalorder %s422_s18, 0 }
   0xb   : > { %p685_p4 = por %p48_p2, %p47_p1  ;;  %s35_s23 = ssub.s32 %s616_s16, %s800_s20 }
   0xc   : > { %p121_p6 = scmp.eq.s32.totalorder %s422_s18, 1  ;;  %p38_p7 = scmp.eq.s32.totalorder %s35_s23, 0 }
   0xd   : > { %p691_p8 = por %p54_p5, %p53_p3  ;;  %p127_p10 = scmp.eq.s32.totalorder %s423_s19, 1 }
   0xe   : > { %p695_p9 = por %p121_p6, %p47_p1  ;;  %p425_p12 = scmp.ge.s32.totalorder %s620_s17, 2 }
   0xf   : > { %s700_s26 = scalar_select %p38_p7, %s608_s14, %s40_s21  }
  0x10   : > { %p702_p11 = por %p127_p10, %p53_p3  ;;  %p451_p13 = scmp.lt.s32.totalorder %s620_s17, 2 }
  0x11   : > { %s153_s28 = sand.u32 1, %s608_s14   ;;  %s437_s30 = sshll.u32 %s616_s16, 3 }
  0x12   : > { %s426_s29 = sshll.u32 %s153_s28, 3  ;;  %s164_s6 = scalar_lea.hbm %s786_s0, %s437_s30 }
  0x13   : > { %s157_s7 = scalar_lea.vmem [#allocation2], %s426_s29  ;;  %s166_s9 = sshll.u32 %s164_s6, 4  ;;  %s167_s9 = int_to_ptr.hbm [resolvable:$true] %s166_s9 }
  0x14   : > { %s168_s8 = sshll.u32 %s157_s7, 4  ;;  %p444_p0 = pnand %p451_p13, %p685_p4  ;;  %s169_s8 = int_to_ptr.vmem [resolvable:$true] %s168_s8 }
  0x15   : > { %p429_p1 = scmp.ge.s32.totalorder %s620_s17, 1  ;;  %p173_p2 = scmp.lt.s32.totalorder %s620_s17, 3 }
  0x16   : > { %s154_s10 = scalar_lea.sflag [#allocation3], %s153_s28 }
  0x17   : > { %446 = dma.hbm_to_vmem [thread:$0]  (!%p444_p0), %s167_s9, 128, %s169_s8, %s154_s10  }
  0x18   : > { %p174_p3 = pnand %p429_p1, %p173_p2 }
  0x19   : > { %s718_s11 = sand.u32 (!%p174_p3), 1, %s604_s13  }
  0x1a   : > { %177 = sbr.rel (%p174_p3) target bundleno = 164 (0xa4), region = 32  ;;  %s430_s18 = sshll.u32 (!%p174_p3), %s718_s11, 3 }
  0x1b   : > { %s180_s19 = scalar_lea.sflag (!%p174_p3), [#allocation3], %s718_s11  ;;  %s183_s21 = scalar_lea.vmem (!%p174_p3), [#allocation2], %s430_s18 }
  0x1f   : > { %591 = dma.done.wait (%p691_p8), %s180_s19, 128  }
  0x20   : > { %593 = vsyncadd (%p691_p8), %s180_s19, 4294967168  ;;  %v622_v0 = vmov 0   ;;  %v284_v1 = vld [vmem:[%s787_s1] sm:$0xf]  ;;  %v734_v3 = vld [vmem:[%s183_s21] sm:$0xff]  ;;  %vm216_vm0 = vcmask 1043456  }
  0x21   : > { %503 = vset.pattern.permute.xlu0 %v622_v0  ;;  %v285_v2 = vld [vmem:[%s788_s2] sm:$0xf]  ;;  %211 = vst [vmem:[#allocation1] ss:$2 sm:$0xff] %v734_v3  ;;  %v231_v4 = vmul.f32 %v734_v3, %v734_v3  ;;  %v623_v63 = vmov 839922192  }
  0x22   : > { %300 = vperm.xlu0 %503, %v284_v1   ;;  %v303_v0 = vunpack.c.l.s4 %v623_v63  ;;  %s438_s24 = sshll.u32 %s612_s15, 3  ;;  %s206_s6 = scalar_lea.vmem [#allocation5], %s430_s18 }
  0x23   : > { %s333_s5 = scalar_lea.hbm %s789_s3, %s438_s24  ;;  %s335_s7 = sshll.u32 %s206_s6, 4  ;;  %s336_s7 = int_to_ptr.vmem [resolvable:$true] %s335_s7 }
  0x24   : > { %s337_s8 = sshll.u32 %s333_s5, 4  ;;  %s320_s9 = scalar_lea.sflag [#allocation4], %s718_s11  ;;  %s338_s8 = int_to_ptr.hbm [resolvable:$true] %s337_s8 }
  0x25   : > { %s552_s15 = sshra.s32 %s338_s8, 4  ;;  %s558_s18 = scalar_lea.hbm %s789_s3, 16  ;;  %s553_s15 = int_to_ptr.hbm [resolvable:$true] %s552_s15 }
  0x26   : > { %s554_s10 = scalar_lea.hbm %s553_s15, 8  ;;  %p559_p7 = scmp.lt.s32.totalorder %s553_s15, %s789_s3 }
  0x27   : > { %p555_p4 = scmp.ne.s32.totalorder %s553_s15, %s554_s10  ;;  %p560_p8 = scmp.lt.s32.totalorder %s558_s18, %s554_s10 }
  0x28   : > { %v212_v5 = vld.sshfl [vmem:[#allocation1] sm:$0xff pattern:$0x75316420]  ;;  %v213_v6 = vld.sshfl [vmem:[#allocation1 + $0x8] sm:$0xff pattern:$0x75316420] }
  0x29   : > { %233 = vst [vmem:[#allocation1] ss:$2 sm:$0xff] %v231_v4  ;;  %v224_v7 = vsel %vm216_vm0, %v213_v6, 0.0  ;;  %v217_v10 = vsel %vm216_vm0, %v212_v5, 0.0  ;;  %v304_v6 = vunpack.c.0.s8 %v303_v0  ;;  %p556_p5 = pnand %p555_p4, %p695_p9  ;;  %p561_p10 = por %p560_p8, %p559_p7 }
  0x2a   : > { %310 = vperm.xlu0 %503, %v285_v2   ;;  %v225_v8 = vrot.slane %v224_v7, 4  ;;  %v218_v12 = vrot.slane %v217_v10, 4 }
  0x2b   : > { %p557_p6 = pneg %p556_p5 }
  0x2c   : > { %v226_v13 = vadd.f32 %v225_v8, %v224_v7  ;;  %v219_v17 = vadd.f32 %v218_v12, %v217_v10 }
  0x2d   : > { %p562_p13 = pnand %p561_p10, %p557_p6 }
  0x2e   : > { %v227_v18 = vrot.slane %v226_v13, 2  ;;  %v220_v21 = vrot.slane %v219_v17, 2 }
  0x30   : > { %v235_v9 = vld.sshfl [vmem:[#allocation1 + $0x8] sm:$0xff pattern:$0x75316420]  ;;  %v234_v14 = vld.sshfl [vmem:[#allocation1] sm:$0xff pattern:$0x75316420]  ;;  %v228_v22 = vadd.f32 %v227_v18, %v226_v13  ;;  %v221_v25 = vadd.f32 %v220_v21, %v219_v17 }
  0x31   : > { %v245_v11 = vsel %vm216_vm0, %v235_v9, 0.0  ;;  %v238_v16 = vsel %vm216_vm0, %v234_v14, 0.0 }
  0x32   : > { %v246_v15 = vrot.slane %v245_v11, 4  ;;  %v239_v19 = vrot.slane %v238_v16, 4  ;;  %v229_v26 = vrot.slane %v228_v22, 1  ;;  %v222_v29 = vrot.slane %v221_v25, 1 }
  0x34   : > { %v247_v20 = vadd.f32 %v246_v15, %v245_v11  ;;  %v240_v23 = vadd.f32 %v239_v19, %v238_v16  ;;  %v230_v30 = vadd.f32 %v229_v26, %v228_v22  ;;  %v223_v33 = vadd.f32 %v222_v29, %v221_v25 }
  0x36   : > { %v248_v24 = vrot.slane %v247_v20, 2  ;;  %v241_v27 = vrot.slane %v240_v23, 2  ;;  %v253_v36 = vmul.f32 0.25, %v230_v30  ;;  %v252_v38 = vmul.f32 0.25, %v223_v33 }
  0x38   : > { %v249_v28 = vadd.f32 %v248_v24, %v247_v20  ;;  %v242_v31 = vadd.f32 %v241_v27, %v240_v23  ;;  %v257_v40 = vmul.f32 %v253_v36, %v253_v36  ;;  %v256_v42 = vmul.f32 %v252_v38, %v252_v38 }
  0x39   : > { %v288_v60 = vrot.slane %v253_v36, 4 }
  0x3a   : > { %v250_v32 = vrot.slane %v249_v28, 1  ;;  %v243_v34 = vrot.slane %v242_v31, 1 }
  0x3b   : > { %v289_v1 = vsel %vm216_vm0, %v252_v38, %v288_v60 }
  0x3c   : > { %v251_v35 = vadd.f32 %v250_v32, %v249_v28  ;;  %v244_v37 = vadd.f32 %v243_v34, %v242_v31  ;;  %v291_v7 = vsub.f32 %v734_v3, %v289_v1 }
  0x3e   : > { %v255_v39 = vmul.f32 0.25, %v251_v35  ;;  %v254_v41 = vmul.f32 0.25, %v244_v37 }
  0x40   : > { %v259_v43 = vsub.f32 %v255_v39, %v257_v40  ;;  %v258_v44 = vsub.f32 %v254_v41, %v256_v42 }
  0x42   : > { %v261_v45 = vmax.f32 %v259_v43, 0.0  ;;  %v260_v46 = vmax.f32 %v258_v44, 0.0 }
  0x44   : > { %v263_v47 = vadd.f32 1e-06, %v261_v45  ;;  %v262_v48 = vadd.f32 1e-06, %v260_v46 }
  0x46   : > { %504 = vrsqrt.f32 %v263_v47  ;;  %vm280_vm1 = vweird.f32 %v263_v47  ;;  %vm270_vm4 = vweird.f32 %v262_v48 }
  0x47   : > { %506 = vrsqrt.f32 %v262_v48 }
  0x4c   : > { %v505_v49 = vpop.eup %504 }
  0x4d   : > { %v275_v50 = vmul.f32 %v505_v49, %v263_v47  ;;  %v507_v51 = vpop.eup %506  ;;  %vm281_vm2 = vweird.f32 %v505_v49 }
  0x4e   : > { %v265_v52 = vmul.f32 %v507_v51, %v262_v48  ;;  %vm282_vm3 = vmor %vm280_vm1, %vm281_vm2  ;;  %vm271_vm5 = vweird.f32 %v507_v51 }
  0x4f   : > { %v276_v53 = vmul.f32 %v505_v49, %v275_v50  ;;  %vm272_vm6 = vmor %vm270_vm4, %vm271_vm5 }
  0x50   : > { %v266_v54 = vmul.f32 %v507_v51, %v265_v52 }
  0x51   : > { %v277_v55 = vmul.f32 0.5, %v276_v53 }
  0x52   : > { %v267_v56 = vmul.f32 0.5, %v266_v54 }
  0x53   : > { %v278_v57 = vsub.f32 1.5, %v277_v55 }
  0x54   : > { %v268_v58 = vsub.f32 1.5, %v267_v56 }
  0x55   : > { %v279_v59 = vmul.f32 %v505_v49, %v278_v57 }
  0x56   : > { %v269_v61 = vmul.f32 %v507_v51, %v268_v58 }
  0x57   : > { %v283_v62 = vsel %vm282_vm3, %v505_v49, %v279_v59 }
  0x58   : > { %v294_v2 = vrot.slane %v283_v62, 4  ;;  %v273_v4 = vsel %vm272_vm6, %v507_v51, %v269_v61 }
  0x5a   : > { %v295_v8 = vsel %vm216_vm0, %v273_v4, %v294_v2 }
  0x5b   : > { %v297_v9 = vmul.f32 %v295_v8, %v291_v7 }
  0x94   : > { %v301_v5 = vpop.permute.xlu0 %300 }
  0x95   : > { %v305_v10 = vperm.slane %v301_v5, %v304_v6 }
  0x97   : > { %v307_v12 = vmul.f32 %v305_v10, %v297_v9 }
  0x9c   : > { %v311_v11 = vpop.permute.xlu0 %310 }
  0x9d   : > { %v315_v13 = vperm.slane %v311_v11, %v304_v6 }
  0x9f   : > { %v317_v14 = vadd.f32 %v315_v13, %v307_v12 }
  0xa1   : > { %318 = vst [vmem:[%s206_s6] sm:$0xff] %v317_v14 }
  0xa2   : > { %565 = shalt.err (!%p562_p13)
}
  0xa3   : > { %441 = dma.vmem_to_hbm [thread:$0]  (%p695_p9), %s336_s7, 128, %s338_s8, %s320_s9  }
  0xa4 PF: > { %s349_s11 = sand.u32 1, %s600_s12   ;;  %p448_p0 = pnand %p425_p12, %p702_p11 }
  0xa5   : > { %s350_s28 = scalar_lea.sflag [#allocation4], %s349_s11 }
  0xa6   : > { %p449_p1 = pneg %p448_p0 }
  0xa8   : > { %595 = dma.done.wait (%p449_p1), %s350_s28, 128  }
  0xa9   : > { %597 = vsyncadd (%p449_p1), %s350_s28, 4294967168  ;;  %s19_s17 = sadd.s32 1, %s620_s17   ;;  %s794_s12 = smov %s604_s13 }
  0xaa   : > { %p16_p2 = scmp.ge.s32.totalorder %s19_s17, 4   ;;  %s795_s13 = smov %s608_s14 }
  0xab   : > { %s796_s14 = smov %s700_s26  ;;  %s797_s15 = smov %s616_s16 }
  0xac   : > { %s798_s16 = smov %s800_s20  ;;  %18 = sbr.rel (!%p16_p2) target bundleno = 6 (0x6), region = 77 }
  0xb1   :  { %356 = vsyncpa [#allocation3], 1 }
  0xb2   :  { %358 = vsyncpa [#allocation3 + $0x1], 1 }
  0xb3   :  { %359 = vsyncpa [#allocation4], 1 }
  0xb4   :  { %361 = vsyncpa [#allocation4 + $0x1], 1 }

</bundles_post_ra>
